<compile_context>
chip_gen: v5e
topology: v5e:2x2
jax: 0.10.0
libtpu: 0.0.40
codegen_flags: <defaults>
</compile_context>

<pallas_src>
import functools
from math import log

import jax
import jax.numpy as jnp
from jax import lax
from jax.experimental import pallas as pl
from jax.experimental.pallas import tpu as pltpu

PREFEAT_DIM = 128          # hard-coded in the PyTorch module
MAX_ROW_TILE = 512
MAX_COL_TILE = 512

_VMEM_LIMIT_CACHE = []


def _vmem_limit():
    """VMEM budget with headroom (v7x has only 64 MiB physical per TC)."""
    if not _VMEM_LIMIT_CACHE:
        try:
            cap = int(pltpu.get_tpu_info().vmem_capacity_bytes)
            lim = min(cap * 3 // 4, 100 * 1024 * 1024)
        except Exception:
            lim = 48 * 1024 * 1024          # safe default everywhere (incl. v7x)
        _VMEM_LIMIT_CACHE.append(lim)
    return _VMEM_LIMIT_CACHE[0]


def _round_up(x, m):
    return ((x + m - 1) // m) * m


def _row_tiling(n, max_rows=MAX_ROW_TILE):
    """Row tile that divides the padded row count (<= 127 wasted rows)."""
    if n <= max_rows:
        tm = _round_up(n, 16)
        return tm, tm
    npad = _round_up(n, 128)
    tm = 128
    for cand in range(max_rows // 128, 0, -1):
        if (npad // 128) % cand == 0:
            tm = 128 * cand
            break
    return npad, tm


def _col_tiling(cout, max_cols=MAX_COL_TILE):
    cpad = _round_up(cout, 128)
    tn = 128
    for cand in range(min(cpad, max_cols) // 128, 0, -1):
        if (cpad // 128) % cand == 0:
            tn = 128 * cand
            break
    return cpad, tn


# ----------------------------------------------------------------------------
# Kernel 1: fused matmul*scale + bias + activation (standalone 1x1 convs).
#   bf16 operands, f32 accumulation.  Row AND column grid so wide outputs
#   (cond projection, cout = L*2*Wp) never blow the VMEM budget.  The rezero
#   scalar lives in SMEM -> the packed cond weight stays bf16 and is never
#   rescaled / recast by XLA per forward call.
# ----------------------------------------------------------------------------
def _mm_bias_act_kernel(*refs, act, scaled):
    if scaled:
        s_ref, x_ref, w_ref, b_ref, o_ref = refs
    else:
        x_ref, w_ref, b_ref, o_ref = refs
    y = jnp.dot(x_ref[...], w_ref[...], preferred_element_type=jnp.float32)
    if scaled:
        y = y * s_ref[0]
    y = y + b_ref[...]
    if act == "relu":
        y = jnp.maximum(y, 0.0)
    elif act == "silu":
        y = y * jax.nn.sigmoid(y)
    o_ref[...] = y.astype(o_ref.dtype)


def pallas_linear(x, w, b, act="none", out_dtype=jnp.float32, scale=None,
                  max_rows=MAX_ROW_TILE, max_cols=MAX_COL_TILE):
    """Channel-last 1x1 conv == matmul over the last dim, fused scale+bias+act."""
    orig_shape = x.shape
    cin = orig_shape[-1]
    cout = w.shape[-1]
    x2 = x.reshape(-1, cin)
    if x2.dtype != jnp.bfloat16:
        x2 = x2.astype(jnp.bfloat16)
    n = x2.shape[0]
    npad, tm = _row_tiling(n, max_rows)
    if npad != n:
        x2 = jnp.pad(x2, ((0, npad - n), (0, 0)))
    cpad, tn = _col_tiling(cout, max_cols)
    wb = w if w.dtype == jnp.bfloat16 else w.astype(jnp.bfloat16)
    bb = jnp.asarray(b, jnp.float32).reshape(1, cout)
    if cpad != cout:
        wb = jnp.pad(wb, ((0, 0), (0, cpad - cout)))
        bb = jnp.pad(bb, ((0, 0), (0, cpad - cout)))
    scaled = scale is not None
    in_specs = [
        pl.BlockSpec((tm, cin), lambda i, j: (i, 0)),
        pl.BlockSpec((cin, tn), lambda i, j: (0, j)),
        pl.BlockSpec((1, tn), lambda i, j: (0, j)),
    ]
    args = [x2, wb, bb]
    if scaled:
        in_specs = [pl.BlockSpec(memory_space=pltpu.MemorySpace.SMEM)] + in_specs
        args = [jnp.asarray(scale, jnp.float32).reshape(1)] + args
    out = pl.pallas_call(
        functools.partial(_mm_bias_act_kernel, act=act, scaled=scaled),
        out_shape=jax.ShapeDtypeStruct((npad, cpad), out_dtype),
        grid=(npad // tm, cpad // tn),
        in_specs=in_specs,
        out_specs=pl.BlockSpec((tm, tn), lambda i, j: (i, j)),
        compiler_params=pltpu.CompilerParams(
            dimension_semantics=("parallel", "parallel"),
            vmem_limit_bytes=_vmem_limit()),
    )(*args)
    if npad != n or cpad != cout:
        out = out[:n, :cout]
    return out.reshape(orig_shape[:-1] + (cout,))


# ----------------------------------------------------------------------------
# Kernel 2: melody encoder, both ConvNorm layers fused (Cin=1 outer product +
# SiLU + 128x128 matmul + SiLU).  The [B, T, 128] intermediate never hits HBM.
# ----------------------------------------------------------------------------
def _melody_kernel(f0_ref, w1_ref, b1_ref, w2_ref, b2_ref, o_ref):
    x1 = f0_ref[...] * w1_ref[...] + b1_ref[...]          # (tm,1)*(1,128)->(tm,128)
    x1 = x1 * jax.nn.sigmoid(x1)                          # SiLU (layer 1)
    y = (jnp.dot(x1.astype(jnp.bfloat16), w2_ref[...],
                 preferred_element_type=jnp.float32) + b2_ref[...])
    y = y * jax.nn.sigmoid(y)                             # SiLU (layer 2)
    o_ref[...] = y.astype(o_ref.dtype)


def pallas_melody_encoder(logf0, w1, b1, w2, b2, max_rows=MAX_ROW_TILE):
    B, T_pad = logf0.shape
    D = w1.shape[-1]
    n = B * T_pad
    x2 = logf0.reshape(n, 1).astype(jnp.float32)
    npad, tm = _row_tiling(n, max_rows)
    if npad != n:
        x2 = jnp.pad(x2, ((0, npad - n), (0, 0)))
    out = pl.pallas_call(
        _melody_kernel,
        out_shape=jax.ShapeDtypeStruct((npad, D), jnp.bfloat16),
        grid=(npad // tm,),
        in_specs=[
            pl.BlockSpec((tm, 1), lambda i: (i, 0)),
            pl.BlockSpec((1, D), lambda i: (0, 0)),
            pl.BlockSpec((1, D), lambda i: (0, 0)),
            pl.BlockSpec((D, D), lambda i: (0, 0)),
            pl.BlockSpec((1, D), lambda i: (0, 0)),
        ],
        out_specs=pl.BlockSpec((tm, D), lambda i: (i, 0)),
        compiler_params=pltpu.CompilerParams(
            dimension_semantics=("parallel",),
            vmem_limit_bytes=_vmem_limit()),
    )(x2, jnp.asarray(w1, jnp.float32).reshape(1, D),
      jnp.asarray(b1, jnp.float32).reshape(1, D),
      w2.astype(jnp.bfloat16), jnp.asarray(b2, jnp.float32).reshape(1, D))
    if npad != n:
        out = out[:n]
    return out.reshape(B, T_pad, D)


# ----------------------------------------------------------------------------
# Kernel 3: fully fused DilatedWN denoiser.
#   grid = (B, n_layers); h / skip live in VMEM scratch across the layer axis.
# ----------------------------------------------------------------------------
def _wn_fused_kernel(msk_ref, xm_ref, sb_ref, cp_ref, ti_ref,
                     wk_ref, wrs_ref, brs_ref, wsm_ref, wend_ref, bend_ref,
                     out_ref, h_scr, s_scr, *, Wp, T_pad, resident):
    l = pl.program_id(1)
    n_layers = pl.num_programs(1)

    msk = msk_ref[0]                      # (T_pad, 3) masks, precomputed per call
    lenm = msk[:, 0:1]                    # t < mel_length[b]
    nf = msk[:, 1:2]                      # t != 0
    nl = msk[:, 2:3]                      # t != T_pad-1

    # ---- layer 0: fused start conv (mel part) + per-utterance step bias ----
    @pl.when(l == 0)
    def _():
        h0 = jnp.dot(xm_ref[0], wsm_ref[...], preferred_element_type=jnp.float32)
        h_scr[...] = (h0 + sb_ref[0]) * lenm     # mask once: padded rows stay 0
        s_scr[...] = jnp.zeros_like(s_scr)

    if resident:                                  # weight stacks fully VMEM-resident
        base = l * 3
        wk0, wk1, wk2 = wk_ref[base], wk_ref[base + 1], wk_ref[base + 2]
        wrs = wrs_ref[l]
    else:                                         # streamed along the layer axis
        wk0, wk1, wk2 = wk_ref[0], wk_ref[1], wk_ref[2]
        wrs = wrs_ref[0]
    brs = brs_ref[l]

    # ---- gated dilated conv (k=3, d=1) from the VMEM-resident h ----
    h = h_scr[...]                                # padded-time rows are provably 0
    hm1 = pltpu.roll(h, 1, 0) * nf                # h[t-1]  (zeroed at t == 0)
    hp1 = pltpu.roll(h, T_pad - 1, 0) * nl        # h[t+1]  (zeroed at t == T_pad-1)
    # TODO(synk): on v5e/v6e (MRF) materialize hcat=[hm1|h|hp1] and do one
    # K=3*Wp matmul to cut MXU push/pop overhead; keep 3 matmuls on v7x (MRB).
    acts = (jnp.dot(hm1.astype(jnp.bfloat16), wk0, preferred_element_type=jnp.float32)
            + jnp.dot(h.astype(jnp.bfloat16), wk1, preferred_element_type=jnp.float32)
            + jnp.dot(hp1.astype(jnp.bfloat16), wk2, preferred_element_type=jnp.float32)
            + cp_ref[0].astype(jnp.float32)       # rz*cond_tv@wc + (b_t|b_s)
            + ti_ref[0, 0])                       # rz*cond_ti@wc  (per-(b,l) bias)
    z = jnp.tanh(acts[:, :Wp]) * jax.nn.sigmoid(acts[:, Wp:])

    # residual + skip in one packed (rezero-folded) matmul; mask the increment
    # so h / skip stay zero past the utterance length (keeps the roll correct).
    rs = (jnp.dot(z.astype(jnp.bfloat16), wrs,
                  preferred_element_type=jnp.float32) + brs) * lenm
    h_scr[...] = h_scr[...] + rs[:, :Wp]
    s_scr[...] = s_scr[...] + rs[:, Wp:]

    # ---- last layer: fused relu + end conv + output mask (lane-dense store) ----
    @pl.when(l == n_layers - 1)
    def _():
        sk = jnp.maximum(s_scr[...], 0.0).astype(jnp.bfloat16)
        o = jnp.dot(sk, wend_ref[...], preferred_element_type=jnp.float32)
        o = (o + bend_ref[...]) * lenm
        out_ref[0] = o.astype(out_ref.dtype)


def pallas_wn_denoiser(packed, masks, x_mel, sbias, cond_proj, ti_bias, T_pad):
    B = x_mel.shape[0]
    Wp, L, NMp = packed["Wp"], packed["L"], packed["NMp"]
    W2 = 2 * Wp
    resident = packed["resident"]
    if resident:
        # whole weight stacks loaded once, kept VMEM-resident across (b, l)
        wk_spec = pl.BlockSpec((3 * L, Wp, W2), lambda b, l: (0, 0, 0))
        wrs_spec = pl.BlockSpec((L, Wp, W2), lambda b, l: (0, 0, 0))
    else:
        # stream only the current layer's weights along the (inner) layer axis
        wk_spec = pl.BlockSpec((3, Wp, W2), lambda b, l: (l, 0, 0))
        wrs_spec = pl.BlockSpec((1, Wp, W2), lambda b, l: (l, 0, 0))
    grid_spec = pltpu.PrefetchScalarGridSpec(
        num_scalar_prefetch=0,
        grid=(B, L),
        in_specs=[
            pl.BlockSpec((1, T_pad, 3), lambda b, l: (b, 0, 0)),      # masks
            pl.BlockSpec((1, T_pad, NMp), lambda b, l: (b, 0, 0)),    # noisy mel (lane-padded)
            pl.BlockSpec((1, 1, Wp), lambda b, l: (b, 0, 0)),         # start bias (per utt)
            # TODO(synk): on v5e consider pipeline_mode=pl.Buffered(3) here if
            # the per-layer cond slab DMA is still exposed after weight residency.
            pl.BlockSpec((1, T_pad, W2), lambda b, l: (b, 0, l)),     # cond slab (lane-blocked, no transpose)
            pl.BlockSpec((1, 1, 1, W2), lambda b, l: (b, l, 0, 0)),   # time-invariant cond bias
            wk_spec,                                                  # gate weights
            wrs_spec,                                                 # res|skip weights
            pl.BlockSpec((L, 1, W2), lambda b, l: (0, 0, 0)),         # res|skip bias (resident)
            pl.BlockSpec((NMp, Wp), lambda b, l: (0, 0)),             # start conv (mel part)
            pl.BlockSpec((Wp, NMp), lambda b, l: (0, 0)),             # end conv
            pl.BlockSpec((1, NMp), lambda b, l: (0, 0)),              # end bias
        ],
        out_specs=pl.BlockSpec((1, T_pad, NMp), lambda b, l: (b, 0, 0)),
        scratch_shapes=[pltpu.VMEM((T_pad, Wp), jnp.float32),   # h
                        pltpu.VMEM((T_pad, Wp), jnp.float32)],  # skip
    )
    # TODO(synk): for B == 1 serving on v7x add a second parallel axis (split
    # T_pad into halo-aware chunks) so both TensorCores are busy.
    return pl.pallas_call(
        functools.partial(_wn_fused_kernel, Wp=Wp, T_pad=T_pad, resident=resident),
        grid_spec=grid_spec,
        out_shape=jax.ShapeDtypeStruct((B, T_pad, NMp), jnp.float32),
        compiler_params=pltpu.CompilerParams(
            dimension_semantics=("parallel", "arbitrary"),
            vmem_limit_bytes=_vmem_limit()),
    )(masks, x_mel, sbias, cond_proj, ti_bias,
      packed["wk"], packed["wrs"], packed["brs"],
      packed["w_start_mel"], packed["w_end"], packed["b_end"])


# ----------------------------------------------------------------------------
# Parameters / diffusion tables (deterministic synthetic init)
# ----------------------------------------------------------------------------
def _dense_init(key, cin, cout):
    kw, kb = jax.random.split(key)
    w = jax.random.normal(kw, (cin, cout), jnp.float32) * (1.0 / (cin ** 0.5))
    b = jax.random.normal(kb, (cout,), jnp.float32) * 0.01
    return w, b


class Diffusion:
    def __init__(self, lin_start=1e-4, lin_end=0.06, n_steps=100):
        betas = jnp.linspace(lin_start, lin_end, n_steps, dtype=jnp.float32)
        alphas = 1.0 - betas
        ac = jnp.cumprod(alphas)
        self.num_timesteps = n_steps
        self.sqrt_ac = jnp.sqrt(ac)
        self.sqrt_om_ac = jnp.sqrt(1.0 - ac)
        self.sqrt_recip_ac = jnp.sqrt(1.0 / ac)
        self.sqrt_recipm1_ac = jnp.sqrt(1.0 / ac - 1.0)


def init_params(key, h):
    keys = iter(jax.random.split(key, 64))
    p = {}
    spk = h["speaker_embed_dim"]
    p["spk_embedding"] = jax.random.normal(next(keys), (h["n_speakers"], spk), jnp.float32) * 0.1
    # SpeakerEncoder ConvStack: (spk+4 -> 2spk -> 2spk -> 2spk), kernel_size=1, ReLU
    dims = [spk + 4, 2 * spk, 2 * spk, 2 * spk]
    p["spk_conv"] = [_dense_init(next(keys), dims[i], dims[i + 1]) for i in range(3)]
    # GLU: ConvNorm(2spk -> 2spk) then gated halves
    p["glu"] = _dense_init(next(keys), 2 * spk, 2 * spk)
    # prefeat encoders (SiLU, 1 -> 128 -> 128)
    for name in ("loudness", "melody", "step"):
        p[name] = [_dense_init(next(keys), 1, PREFEAT_DIM),
                   _dense_init(next(keys), PREFEAT_DIM, PREFEAT_DIM)]
    p["cond_rezero"] = jnp.float32(0.001)
    # DilatedWN denoiser
    wn = h["wn_dim"]
    n_mel = h["n_mel_channels"]
    cond_dim = 2 * PREFEAT_DIM + h["n_symbols"] + spk
    p["wn_start"] = _dense_init(next(keys), n_mel + PREFEAT_DIM, wn)
    layers = []
    for _ in range(h["wn_n_blocks"] * h["wn_n_layers"]):
        lp = {}
        lp["wk_t"], lp["b_t"] = _dense_init(next(keys), 3 * wn, wn)
        lp["wk_s"], lp["b_s"] = _dense_init(next(keys), 3 * wn, wn)
        lp["wc_t"], _ = _dense_init(next(keys), cond_dim, wn)
        lp["wc_s"], _ = _dense_init(next(keys), cond_dim, wn)
        lp["w_res"], lp["b_res"] = _dense_init(next(keys), wn, wn)
        lp["w_skip"], lp["b_skip"] = _dense_init(next(keys), wn, wn)
        lp["rz"] = jnp.float32(0.02)
        layers.append(lp)
    p["wn_layers"] = layers
    p["wn_end"] = _dense_init(next(keys), wn, n_mel)
    return p


def pack_wn_params(params, h):
    """One-time repacking for the fused denoiser kernel (lane-dense, rezero folded).

    The hidden dim W, the tanh|sigmoid gate boundary and the mel output dim are
    zero-padded to multiples of 128 lanes (numerically exact: padded channels
    stay zero through the gate / residual / skip path).  The cond weight is
    split into time-varying (melody+ppg) and time-invariant (speaker+loudness)
    row blocks and stored once; cond_rezero is applied at call time in-kernel.
    """
    W = h["wn_dim"]
    n_mel = h["n_mel_channels"]
    spk = h["speaker_embed_dim"]
    Wp = _round_up(W, 128)
    NMp = _round_up(n_mel, 128)
    n_ti = spk + PREFEAT_DIM                 # speaker + loudness rows (time-invariant)
    layers = params["wn_layers"]
    L = len(layers)

    def two_halves(wt, ws):
        # [rows, W] tanh half | [rows, W] sigmoid half -> [rows, 2*Wp], lane padded
        rows = wt.shape[0]
        out = jnp.zeros((rows, 2 * Wp), jnp.float32)
        return out.at[:, :W].set(wt).at[:, Wp:Wp + W].set(ws)

    def pad_rows(m, rows_to):
        return jnp.pad(m, ((0, rows_to - m.shape[0]), (0, 0)))

    wk, wrs, brs, b_ts, wc_ti, wc_tv = [], [], [], [], [], []
    for lp in layers:
        for k in range(3):
            wk.append(pad_rows(two_halves(lp["wk_t"][k * W:(k + 1) * W],
                                          lp["wk_s"][k * W:(k + 1) * W]), Wp))
        wrs.append(pad_rows(lp["rz"] * two_halves(lp["w_res"], lp["w_skip"]), Wp))
        brs.append(lp["rz"] * two_halves(lp["b_res"][None, :], lp["b_skip"][None, :]))
        b_ts.append(two_halves(lp["b_t"][None, :], lp["b_s"][None, :])[0])
        wc = two_halves(lp["wc_t"], lp["wc_s"])              # [cond_dim, 2*Wp]
        wc_ti.append(wc[:n_ti])
        wc_tv.append(wc[n_ti:])

    w_start, b_start = params["wn_start"]
    w_end, b_end = params["wn_end"]
    w_start_mel = jnp.zeros((NMp, Wp), jnp.float32).at[:n_mel, :W].set(w_start[:n_mel])
    w_start_step = jnp.zeros((PREFEAT_DIM, Wp), jnp.float32).at[:, :W].set(w_start[n_mel:])
    b_start_p = jnp.zeros((Wp,), jnp.float32).at[:W].set(b_start)
    w_end_p = jnp.zeros((Wp, NMp), jnp.float32).at[:W, :n_mel].set(w_end)
    b_end_p = jnp.zeros((1, NMp), jnp.float32).at[0, :n_mel].set(b_end)

    # keep the per-layer weight stacks fully VMEM-resident when they fit
    # (x2 for double buffering); otherwise stream them along the layer axis.
    weight_bytes = 2 * (3 * L * Wp * 2 * Wp * 2 + L * Wp * 2 * Wp * 2)
    resident = weight_bytes <= _vmem_limit() // 2

    return {
        "W": W, "Wp": Wp, "L": L, "NMp": NMp, "n_ti": n_ti, "resident": resident,
        "wk": jnp.stack(wk).astype(jnp.bfloat16),                      # [3L, Wp, 2Wp]
        "wrs": jnp.stack(wrs).astype(jnp.bfloat16),                    # [L, Wp, 2Wp]
        "brs": jnp.stack(brs).astype(jnp.float32),                     # [L, 1, 2Wp]
        "b_ts_flat": jnp.concatenate(b_ts),                            # [L*2Wp] f32
        "wc_tv": jnp.concatenate(wc_tv, axis=1).astype(jnp.bfloat16),  # [128+n_sym, L*2Wp]
        "wc_ti": jnp.concatenate(wc_ti, axis=1),                       # [spk+128, L*2Wp] f32
        "w_start_mel": w_start_mel.astype(jnp.bfloat16),               # [NMp, Wp]
        "w_start_step": w_start_step,                                  # [128, Wp] f32 (rows==B path)
        "b_start": b_start_p,                                          # [Wp] f32
        "w_end": w_end_p.astype(jnp.bfloat16),                         # [Wp, NMp]
        "b_end": b_end_p,                                              # [1, NMp] f32
    }


# ----------------------------------------------------------------------------
# Forward pass (glue in JAX, hot path in the Pallas kernels above)
# ----------------------------------------------------------------------------
def generator_forward(params, packed, diff, h, inputs, key):
    gt_mel = jnp.transpose(inputs["gt_mel"], (0, 2, 1))              # [B, T, n_mel]
    B, mel_T, n_mel = gt_mel.shape
    mel_std = (1.8 - log(h["stft_clamp_val"])) * 0.5
    mel_mean = (1.8 + log(h["stft_clamp_val"])) * 0.5
    gt_mel = (gt_mel - mel_mean) / mel_std

    k_noise, k_t, k_rz = jax.random.split(key, 3)
    randn_noise = jax.random.normal(k_noise, gt_mel.shape, jnp.float32)
    t = jax.random.randint(k_t, (B,), 0, diff.num_timesteps)
    noise_scalar = diff.sqrt_om_ac[t][:, None, None]                 # [B,1,1]
    noisy_gt_mel = (diff.sqrt_ac[t][:, None, None] * gt_mel
                    + diff.sqrt_om_ac[t][:, None, None] * randn_noise)

    # --- tiny per-utterance heads (rows == B): plain jnp ---
    spk_emb = params["spk_embedding"][inputs["speaker_id"]]
    x = jnp.concatenate([spk_emb, inputs["speaker_f0_meanstd"],
                         inputs["speaker_slyps_meanstd"]], axis=1)   # [B, spk+4]
    for (w, b) in params["spk_conv"]:
        x = jax.nn.relu(x @ w + b)
    wg, bg = params["glu"]
    y = x @ wg + bg
    a_half, g_half = jnp.split(y, 2, axis=-1)
    speaker_embed = a_half * jax.nn.sigmoid(g_half)                  # [B, spk]

    def mlp_silu(v, layers):
        for (w, b) in layers:
            v = jax.nn.silu(v @ w + b)
        return v

    step_feat = mlp_silu(noise_scalar, params["step"])               # [B,1,128]
    loudness_feat = mlp_silu(inputs["gt_perc_loudness"][:, None, None],
                             params["loudness"])                     # [B,1,128]

    Wp, L, NMp = packed["Wp"], packed["L"], packed["NMp"]
    T_pad = _round_up(mel_T, 16)
    pad_t = T_pad - mel_T

    # --- melody encoder: both ConvNorm layers fused in one kernel ---
    logf0 = inputs["gt_frame_logf0"]
    if pad_t:
        logf0 = jnp.pad(logf0, ((0, 0), (0, pad_t)))
    (w1, b1), (w2, b2) = params["melody"]
    logf0_feat = pallas_melody_encoder(logf0, w1, b1, w2, b2)        # [B,T_pad,128] bf16

    ppg = jnp.transpose(inputs["frame_ppg"], (0, 2, 1))              # [B, T, n_sym]
    if pad_t:
        ppg = jnp.pad(ppg, ((0, 0), (0, pad_t), (0, 0)))

    # --- cond projection, split time-varying / time-invariant ---
    # cond_rezero (+ per-call jitter, matching `random.random()*1e-5` in the
    # reference) is applied in-kernel from SMEM; the packed bf16 weight is
    # never rescaled / recast per call.
    rz_c = params["cond_rezero"] + jax.random.uniform(k_rz, ()) * 1e-5
    cond_tv = jnp.concatenate([logf0_feat, ppg.astype(jnp.bfloat16)], axis=2)
    cond_proj = pallas_linear(cond_tv, packed["wc_tv"], packed["b_ts_flat"],
                              act="none", out_dtype=jnp.bfloat16,
                              scale=rz_c)                            # [B,T_pad,L*2Wp]

    ti = jnp.concatenate([speaker_embed, loudness_feat[:, 0, :]], axis=1)   # [B, spk+128]
    ti_bias = (rz_c * (ti @ packed["wc_ti"])).reshape(B, L, 1, 2 * Wp)      # per-(b,l) bias

    # start conv: mel part in-kernel; step-feature part folded into a per-utt bias
    sbias = (step_feat @ packed["w_start_step"] + packed["b_start"]).astype(jnp.float32)

    x_mel = jnp.pad(noisy_gt_mel,
                    ((0, 0), (0, pad_t), (0, NMp - n_mel))).astype(jnp.bfloat16)

    # length / edge masks (hoisted out of the in-kernel layer loop)
    t_idx = jnp.arange(T_pad)
    lenm = (t_idx[None, :] < inputs["mel_lengths"][:, None]).astype(jnp.float32)
    nf = jnp.broadcast_to((t_idx > 0).astype(jnp.float32)[None, :], (B, T_pad))
    nl = jnp.broadcast_to((t_idx < T_pad - 1).astype(jnp.float32)[None, :], (B, T_pad))
    masks = jnp.stack([lenm, nf, nl], axis=2)                        # [B, T_pad, 3]

    pred_pad = pallas_wn_denoiser(packed, masks, x_mel, sbias, cond_proj,
                                  ti_bias, T_pad)                    # [B,T_pad,NMp]
    predicted_randn_noise = pred_pad[:, :mel_T, :n_mel]

    pred_mel = (diff.sqrt_recip_ac[t][:, None, None] * noisy_gt_mel
                - diff.sqrt_recipm1_ac[t][:, None, None] * predicted_randn_noise)

    return {"t": t,
            "noise_scalar": noise_scalar,
            "randn_noise": randn_noise,
            "predicted_randn_noise": predicted_randn_noise,
            "noisy_gt_mel": noisy_gt_mel,
            "pred_mel": pred_mel}


if __name__ == "__main__":
    h = dict(n_mel_channels=16, stft_clamp_val=1e-5, n_speakers=4,
             speaker_embed_dim=16, n_symbols=8, wn_dim=32,
             wn_n_blocks=1, wn_n_layers=2)
    B, mel_T = 2, 16

    key = jax.random.PRNGKey(0)
    k_in, k_param, k_fwd = jax.random.split(key, 3)
    ks = jax.random.split(k_in, 8)
    inputs = {
        "gt_mel": jax.random.normal(ks[0], (B, h["n_mel_channels"], mel_T), jnp.float32),
        "mel_lengths": jnp.array([mel_T, mel_T - 4], dtype=jnp.int32),
        "gt_perc_loudness": jax.random.normal(ks[1], (B,), jnp.float32),
        "gt_frame_logf0": jax.random.normal(ks[2], (B, mel_T), jnp.float32),
        "frame_ppg": jax.nn.softmax(
            jax.random.normal(ks[3], (B, h["n_symbols"], mel_T), jnp.float32), axis=1),
        "speaker_id": jnp.array([0, 3], dtype=jnp.int32),
        "speaker_f0_meanstd": jax.random.normal(ks[4], (B, 2), jnp.float32),
        "speaker_slyps_meanstd": jax.random.normal(ks[5], (B, 2), jnp.float32),
    }

    diff = Diffusion(lin_start=1e-4, lin_end=0.06, n_steps=100)
    params = init_params(k_param, h)
    packed = pack_wn_params(params, h)

    out = generator_forward(params, packed, diff, h, inputs, k_fwd)
    out = jax.block_until_ready(out)

    assert out["pred_mel"].shape == (B, mel_T, h["n_mel_channels"])
    assert out["predicted_randn_noise"].shape == (B, mel_T, h["n_mel_channels"])
    assert out["noisy_gt_mel"].shape == (B, mel_T, h["n_mel_channels"])
    assert bool(jnp.all(jnp.isfinite(out["pred_mel"])))
    print("KERNEL_OK")
</pallas_src>

<mosaic_0001>
module attributes {stable_mosaic.version = 11 : i64} {
  func.func @_melody_kernel(%arg0: i32, %arg1: memref<32x1xf32, #tpu.memory_space<vmem>>, %arg2: memref<1x128xf32, #tpu.memory_space<vmem>>, %arg3: memref<1x128xf32, #tpu.memory_space<vmem>>, %arg4: memref<128x128xbf16, #tpu.memory_space<vmem>>, %arg5: memref<1x128xf32, #tpu.memory_space<vmem>>, %arg6: memref<32x128xbf16, #tpu.memory_space<vmem>>) attributes {dimension_semantics = [#tpu.dimension_semantics<parallel>], iteration_bounds = array<i64: 1>, scalar_prefetch = 0 : i64, scratch_operands = 0 : i64, tpu.core_type = #tpu.core_type<tc>, window_params = [{transform_indices = @transform_0, window_bounds = array<i64: 32, 1>}, {pipeline_mode = #tpu.pipeline_mode<synchronous>, transform_indices = @transform_1, window_bounds = array<i64: 1, 128>}, {pipeline_mode = #tpu.pipeline_mode<synchronous>, transform_indices = @transform_2, window_bounds = array<i64: 1, 128>}, {pipeline_mode = #tpu.pipeline_mode<synchronous>, transform_indices = @transform_3, window_bounds = array<i64: 128, 128>}, {pipeline_mode = #tpu.pipeline_mode<synchronous>, transform_indices = @transform_4, window_bounds = array<i64: 1, 128>}, {transform_indices = @transform_5, window_bounds = array<i64: 32, 128>}]} {
    %c0 = arith.constant 0 : index
    %c0_0 = arith.constant 0 : index
    %0 = vector.load %arg1[%c0, %c0_0] : memref<32x1xf32, #tpu.memory_space<vmem>>, vector<32x1xf32>
    %c0_1 = arith.constant 0 : index
    %c0_2 = arith.constant 0 : index
    %1 = vector.load %arg2[%c0_1, %c0_2] : memref<1x128xf32, #tpu.memory_space<vmem>>, vector<1x128xf32>
    %2 = vector.broadcast %0 : vector<32x1xf32> to vector<32x128xf32>
    %3 = vector.broadcast %1 : vector<1x128xf32> to vector<32x128xf32>
    %4 = arith.mulf %2, %3 : vector<32x128xf32>
    %c0_3 = arith.constant 0 : index
    %c0_4 = arith.constant 0 : index
    %5 = vector.load %arg3[%c0_3, %c0_4] : memref<1x128xf32, #tpu.memory_space<vmem>>, vector<1x128xf32>
    %6 = vector.broadcast %5 : vector<1x128xf32> to vector<32x128xf32>
    %7 = arith.addf %4, %6 : vector<32x128xf32>
    %8 = arith.negf %7 : vector<32x128xf32>
    %9 = math.exp %8 : vector<32x128xf32>
    %cst = arith.constant 1.000000e+00 : f32
    %10 = vector.broadcast %cst : f32 to vector<32x128xf32>
    %11 = arith.addf %10, %9 : vector<32x128xf32>
    %12 = arith.divf %10, %11 : vector<32x128xf32>
    %13 = arith.mulf %7, %12 : vector<32x128xf32>
    %14 = arith.truncf %13 : vector<32x128xf32> to vector<32x128xbf16>
    %c0_5 = arith.constant 0 : index
    %c0_6 = arith.constant 0 : index
    %15 = vector.load %arg4[%c0_5, %c0_6] : memref<128x128xbf16, #tpu.memory_space<vmem>>, vector<128x128xbf16>
    %cst_7 = arith.constant dense<0.000000e+00> : vector<32x128xf32>
    %16 = tpu.matmul %14, %15, %cst_7 {dimension_numbers = #tpu.dot_dimension_numbers<[1], [0], [0], [1], [0, 0, 1, 1], [], []>} : vector<32x128xbf16>, vector<128x128xbf16>, vector<32x128xf32> -> vector<32x128xf32>
    %c0_8 = arith.constant 0 : index
    %c0_9 = arith.constant 0 : index
    %17 = vector.load %arg5[%c0_8, %c0_9] : memref<1x128xf32, #tpu.memory_space<vmem>>, vector<1x128xf32>
    %18 = vector.broadcast %17 : vector<1x128xf32> to vector<32x128xf32>
    %19 = arith.addf %16, %18 : vector<32x128xf32>
    %20 = arith.negf %19 : vector<32x128xf32>
    %21 = math.exp %20 : vector<32x128xf32>
    %cst_10 = arith.constant 1.000000e+00 : f32
    %22 = vector.broadcast %cst_10 : f32 to vector<32x128xf32>
    %23 = arith.addf %22, %21 : vector<32x128xf32>
    %24 = arith.divf %22, %23 : vector<32x128xf32>
    %25 = arith.mulf %19, %24 : vector<32x128xf32>
    %26 = arith.truncf %25 : vector<32x128xf32> to vector<32x128xbf16>
    %c0_11 = arith.constant 0 : index
    %c0_12 = arith.constant 0 : index
    %27 = vector.load %arg6[%c0_11, %c0_12] : memref<32x128xbf16, #tpu.memory_space<vmem>>, vector<32x128xbf16>
    tpu.vector_store %arg6[%c0_11, %c0_12], %26 {strides = array<i32>} : memref<32x128xbf16, #tpu.memory_space<vmem>>, vector<32x128xbf16>,
    return
  }
  func.func @transform_0(%arg0: i32) -> (i32, i32) {
    %c0_i32 = arith.constant 0 : i32
    %c0_i32_0 = arith.constant 0 : i32
    return %arg0, %c0_i32 : i32, i32
  }
  func.func @transform_1(%arg0: i32) -> (i32, i32) {
    %c0_i32 = arith.constant 0 : i32
    %c0_i32_0 = arith.constant 0 : i32
    %c0_i32_1 = arith.constant 0 : i32
    return %c0_i32, %c0_i32_0 : i32, i32
  }
  func.func @transform_2(%arg0: i32) -> (i32, i32) {
    %c0_i32 = arith.constant 0 : i32
    %c0_i32_0 = arith.constant 0 : i32
    %c0_i32_1 = arith.constant 0 : i32
    return %c0_i32, %c0_i32_0 : i32, i32
  }
  func.func @transform_3(%arg0: i32) -> (i32, i32) {
    %c0_i32 = arith.constant 0 : i32
    %c0_i32_0 = arith.constant 0 : i32
    %c0_i32_1 = arith.constant 0 : i32
    return %c0_i32, %c0_i32_0 : i32, i32
  }
  func.func @transform_4(%arg0: i32) -> (i32, i32) {
    %c0_i32 = arith.constant 0 : i32
    %c0_i32_0 = arith.constant 0 : i32
    %c0_i32_1 = arith.constant 0 : i32
    return %c0_i32, %c0_i32_0 : i32, i32
  }
  func.func @transform_5(%arg0: i32) -> (i32, i32) {
    %c0_i32 = arith.constant 0 : i32
    %c0_i32_0 = arith.constant 0 : i32
    return %arg0, %c0_i32 : i32, i32
  }
}

</mosaic_0001>

<bundles_post_ra>
// kernel: tpu_custom_call.1
= control target key start
LH: loop header
LB: loop body
LE: loop exit
PB: predicated region body
PF: predicated region fallthrough
CT: control target
= control target key end

     0   :  { %10 = vsyncpa [#allocation3], 0  ;;  %s646_s0 = inlined_call_operand.vmem [shape: f32[32,1], index: 0, kind: input, shape index: {}]   ;;  %s647_s1 = inlined_call_operand.vmem [shape: f32[1,128], index: 1, kind: input, shape index: {}]   ;;  %s648_s2 = inlined_call_operand.vmem [shape: f32[1,128], index: 2, kind: input, shape index: {}]   ;;  %s649_s3 = inlined_call_operand.hbm [shape: bf16[128,128], index: 3, kind: input, shape index: {}]   ;;  %s650_s4 = inlined_call_operand.vmem [shape: f32[1,128], index: 4, kind: input, shape index: {}]   ;;  %s651_s5 = inlined_call_operand.hbm [shape: bf16[32,128], index: 5, kind: output, shape index: {}]  }
   0x1   :  { %11 = vsyncpa [#allocation4], 0  ;;  %s22_s20 = sshll.u32 %s649_s3, 4  ;;  %s514_s21 = smov [#allocation2]   ;;  %s23_s20 = int_to_ptr.hbm [resolvable:$true] %s22_s20 }
   0x2   :  { %s24_s22 = sshll.u32 %s514_s21, 4  ;;  %s515_s23 = smov 64   ;;  %s25_s22 = int_to_ptr.vmem [resolvable:$true] %s24_s22 }
   0x3   :  { %s516_s24 = smov 4  }
   0x4   :  { %30 = dma.hbm_to_vmem [thread:$0]  %s23_s20, 1024, %s25_s22, [#allocation3], %s515_s23, %s515_s23, %s516_s24  }
   0x5   :  { %510 = dma.done.wait [#allocation3], 1024  }
   0x6   :  { %511 = vsyncadd [#allocation3], 4294966272  ;;  %v517_v0 = vmov 0   ;;  %v39_v1 = vld [vmem:[%s646_s0 + $0x10] sm:$0xff]  ;;  %v37_v2 = vld [vmem:[%s646_s0] sm:$0xff]  ;;  %s340_s13 = sshll.u32 %s651_s5, 4  ;;  %s341_s13 = int_to_ptr.hbm [resolvable:$true] %s340_s13 }
   0x7   :  { %426 = vset.pattern.permute.xlu1 %v517_v0  ;;  %425 = vset.pattern.permute.xlu0 %v517_v0  ;;  %v40_v3 = vld [vmem:[%s646_s0 + $0x18] sm:$0xff]  ;;  %v38_v4 = vld [vmem:[%s646_s0 + $0x8] sm:$0xff]  ;;  %v399_v6 = vld [vmem:[#allocation2 + $0x30] sm:$0xff] }
   0x8   :  { %54 = vperm.xlu1 %426, %v39_v1   ;;  %44 = vperm.xlu0 %425, %v37_v2   ;;  %v400_v5 = vld [vmem:[#allocation2 + $0x38] sm:$0xff]  ;;  %v398_v7 = vld [vmem:[#allocation2 + $0x28] sm:$0xff]  ;;  %v397_v8 = vld [vmem:[#allocation2 + $0x20] sm:$0xff] }
   0x9   :  { %227 = vmatpush.bf16.msra.mxu0 %v400_v5  ;;  %412 = vmatpush.bf16.msra.mxu1 %v400_v5  ;;  %v427_v9 = vld [vmem:[%s647_s1] ss:$0 sm:$0xff]  ;;  %v396_v10 = vld [vmem:[#allocation2 + $0x18] sm:$0xff]  ;;  %v395_v16 = vld [vmem:[#allocation2 + $0x10] sm:$0xff] }
   0xa   :  { %v428_v11 = vld [vmem:[%s648_s2] ss:$0 sm:$0xff]  ;;  %v394_v21 = vld [vmem:[#allocation2 + $0x8] sm:$0xff] }
   0xb   :  { %v393_v26 = vld [vmem:[#allocation2] sm:$0xff] }
   0xd   :  { %228 = vmatpush.bf16.msra.mxu0 %v399_v6  ;;  %413 = vmatpush.bf16.msra.mxu1 %v399_v6 }
  0x10   :  { %59 = vperm.xlu1 %426, %v40_v3   ;;  %49 = vperm.xlu0 %425, %v38_v4  }
  0x11   :  { %229 = vmatpush.bf16.msra.mxu0 %v398_v7  ;;  %414 = vmatpush.bf16.msra.mxu1 %v398_v7 }
  0x15   :  { %230 = vmatpush.bf16.msra.mxu0 %v397_v8  ;;  %415 = vmatpush.bf16.msra.mxu1 %v397_v8 }
  0x19   :  { %231 = vmatpush.bf16.msra.mxu0 %v396_v10  ;;  %416 = vmatpush.bf16.msra.mxu1 %v396_v10 }
  0x1d   :  { %232 = vmatpush.bf16.msra.mxu0 %v395_v16  ;;  %417 = vmatpush.bf16.msra.mxu1 %v395_v16 }
  0x21   :  { %233 = vmatpush.bf16.msra.mxu0 %v394_v21  ;;  %418 = vmatpush.bf16.msra.mxu1 %v394_v21 }
  0x25   :  { %234 = vmatpush.bf16.msra.mxu0 %v393_v26  ;;  %419 = vmatpush.bf16.msra.mxu1 %v393_v26 }
  0x7a   :  { %v55_v12 = vpop.permute.xlu1 %54  ;;  %v45_v13 = vpop.permute.xlu0 %44 }
  0x7b   :  { %v67_v14 = vmul.f32 %v427_v9, %v55_v12  ;;  %v65_v15 = vmul.f32 %v427_v9, %v45_v13 }
  0x7d   :  { %v573_v17 = vadd.f32 %v428_v11, %v67_v14  ;;  %v575_v18 = vadd.f32 %v428_v11, %v65_v15 }
  0x7f   :  { %v355_v19 = vmul.f32 -1.442695, %v573_v17  ;;  %v353_v20 = vmul.f32 -1.442695, %v575_v18 }
  0x81   :  { %430 = vpow2.f32 %v355_v19 }
  0x82   :  { %432 = vpow2.f32 %v353_v20  ;;  %v60_v22 = vpop.permute.xlu1 %59  ;;  %v50_v23 = vpop.permute.xlu0 %49 }
  0x83   :  { %v68_v24 = vmul.f32 %v427_v9, %v60_v22  ;;  %v66_v25 = vmul.f32 %v427_v9, %v50_v23 }
  0x85   :  { %v579_v27 = vadd.f32 %v428_v11, %v68_v24  ;;  %v581_v28 = vadd.f32 %v428_v11, %v66_v25  ;;  %v429_v25 = vld [vmem:[%s650_s4] ss:$0 sm:$0xff]  ;;  %s518_s4 = smov [#allocation5]  }
  0x86   :  { %s338_s10 = sshll.u32 %s518_s4, 4  ;;  %s339_s10 = int_to_ptr.vmem [resolvable:$true] %s338_s10 }
  0x87   :  { %v431_v29 = vpop.eup %430  ;;  %v356_v30 = vmul.f32 -1.442695, %v579_v27  ;;  %v354_v33 = vmul.f32 -1.442695, %v581_v28 }
  0x88   :  { %v433_v31 = vpop.eup %432  ;;  %v91_v32 = vadd.f32 1.0, %v431_v29 }
  0x89   :  { %v89_v34 = vadd.f32 1.0, %v433_v31  ;;  %434 = vpow2.f32 %v356_v30 }
  0x8a   :  { %436 = vrcp.f32 %v91_v32  ;;  %vm128_vm1 = vweird.f32 %v91_v32  ;;  %v132_v50 = vand.u32 2147483647, %v91_v32  ;;  %v134_v51 = vand.u32 2147483648, %v91_v32 }
  0x8b   :  { %438 = vrcp.f32 %v89_v34  ;;  %vm98_vm2 = vweird.f32 %v89_v34  ;;  %v102_v53 = vand.u32 2147483647, %v89_v34  ;;  %v104_v57 = vand.u32 2147483648, %v89_v34 }
  0x8c   :  { %440 = vpow2.f32 %v354_v33  ;;  %vm133_vm6 = vcmp.eq.f32.partialorder %v132_v50, 8.507059e+37  ;;  %v135_v0 = vor.u32 1.1754944e-38, %v134_v51 }
  0x8d   :  { %v105_v9 = vor.u32 1.1754944e-38, %v104_v57  ;;  %vm103_vm12 = vcmp.eq.f32.partialorder %v102_v53, 8.507059e+37 }
  0x8f   :  { %v435_v35 = vpop.eup %434 }
  0x90   :  { %v437_v36 = vpop.eup %436  ;;  %v92_v37 = vadd.f32 1.0, %v435_v35 }
  0x91   :  { %v439_v38 = vpop.eup %438  ;;  %v124_v39 = vmul.f32 %v437_v36, %v91_v32  ;;  %vm129_vm0 = vweird.f32 %v437_v36 }
  0x92   :  { %v441_v40 = vpop.eup %440  ;;  %442 = vrcp.f32 %v92_v37  ;;  %v94_v41 = vmul.f32 %v439_v38, %v89_v34  ;;  %v149_v55 = vand.u32 2147483648, %v92_v37  ;;  %vm99_vm3 = vweird.f32 %v439_v38  ;;  %vm585_vm4 = vmor %vm128_vm1, %vm129_vm0 }
  0x93   :  { %v90_v42 = vadd.f32 1.0, %v441_v40  ;;  %v125_v43 = vsub.f32 1.0, %v124_v39  ;;  %v147_v62 = vand.u32 2147483647, %v92_v37  ;;  %vm143_vm7 = vweird.f32 %v92_v37  ;;  %vm592_vm8 = vmor %vm98_vm2, %vm99_vm3 }
  0x94   :  { %v95_v44 = vsub.f32 1.0, %v94_v41  ;;  %v150_v5 = vor.u32 1.1754944e-38, %v149_v55 }
  0x95   :  { %444 = vrcp.f32 %v90_v42  ;;  %v126_v45 = vmul.f32 %v437_v36, %v125_v43  ;;  %v117_v2 = vand.u32 2147483647, %v90_v42  ;;  %v119_v3 = vand.u32 2147483648, %v90_v42 }
  0x96   :  { %v96_v47 = vmul.f32 %v439_v38, %v95_v44  ;;  %vm148_vm11 = vcmp.eq.f32.partialorder %v147_v62, 8.507059e+37  ;;  %vm113_vm13 = vweird.f32 %v90_v42 }
  0x97   :  { %v127_v48 = vadd.f32 %v437_v36, %v126_v45  ;;  %v120_v14 = vor.u32 1.1754944e-38, %v119_v3  ;;  %vm118_vm15 = vcmp.eq.f32.partialorder %v117_v2, 8.507059e+37 }
  0x98   :  { %v443_v46 = vpop.eup %442  ;;  %v97_v56 = vadd.f32 %v439_v38, %v96_v47 }
  0x99   :  { %v139_v49 = vmul.f32 %v443_v46, %v92_v37  ;;  %v131_v60 = vsel %vm585_vm4, %v437_v36, %v127_v48  ;;  %vm144_vm5 = vweird.f32 %v443_v46 }
  0x9a   :  { %v101_v6 = vsel %vm592_vm8, %v439_v38, %v97_v56  ;;  %v136_v8 = vsel %vm133_vm6, %v135_v0, %v131_v60  ;;  %vm145_vm10 = vmor %vm143_vm7, %vm144_vm5 }
  0x9b   :  { %v445_v52 = vpop.eup %444  ;;  %v140_v54 = vsub.f32 1.0, %v139_v49  ;;  %v106_v13 = vsel %vm103_vm12, %v105_v9, %v101_v6  ;;  %v155_v15 = vmul.f32 %v136_v8, %v573_v17 }
  0x9c   :  { %v109_v58 = vmul.f32 %v445_v52, %v90_v42  ;;  %vm114_vm9 = vweird.f32 %v445_v52  ;;  %v153_v22 = vmul.f32 %v106_v13, %v575_v18 }
  0x9d   :  { %v141_v61 = vmul.f32 %v443_v46, %v140_v54  ;;  %vm115_vm14 = vmor %vm113_vm13, %vm114_vm9 }
  0x9e   :  { %v110_v63 = vsub.f32 1.0, %v109_v58 }
  0x9f   :  { %v142_v4 = vadd.f32 %v443_v46, %v141_v61 }
  0xa0   :  { %v111_v7 = vmul.f32 %v445_v52, %v110_v63 }
  0xa1   :  { %v146_v10 = vsel %vm145_vm10, %v443_v46, %v142_v4 }
  0xa2   :  { %v112_v11 = vadd.f32 %v445_v52, %v111_v7  ;;  %v151_v12 = vsel %vm148_vm11, %v150_v5, %v146_v10 }
  0xa3   :  { %v156_v16 = vmul.f32 %v151_v12, %v579_v27 }
  0xa4   :  { %v116_v19 = vsel %vm115_vm14, %v445_v52, %v112_v11 }
  0xa5   :  { %v121_v20 = vsel %vm118_vm15, %v120_v14, %v116_v19  ;;  %v158_v21 = vpack.c.bf16 %v156_v16, %v155_v15 }
  0xa6   :  { %v154_v23 = vmul.f32 %v121_v20, %v581_v28 }
  0xa7   :  { %240 = vmatmul.bf16.vlgmr.msra.gmra.mxu1 %v158_v21 }
  0xa8   :  { %v157_v24 = vpack.c.bf16 %v154_v23, %v153_v22 }
  0xaa   :  { %235 = vmatmul.bf16.vlgmr.msra.gmra.mxu0 %v157_v24 }
 0x124   :  { %v241_v26 = vpop.f32.mrf.mxu1 }
 0x125   :  { %v606_v29 = vadd.f32 %v429_v25, %v241_v26 }
 0x127   :  { %v236_v17 = vpop.f32.mrf.mxu0  ;;  %v391_v27 = vmul.f32 -1.442695, %v606_v29 }
 0x128   :  { %v609_v30 = vadd.f32 %v429_v25, %v236_v17 }
 0x129   :  { %446 = vpow2.f32 %v391_v27 }
 0x12a   :  { %v389_v18 = vmul.f32 -1.442695, %v609_v30 }
 0x12c   :  { %448 = vpow2.f32 %v389_v18  ;;  %v243_v28 = vpop.f32.mrf.mxu1 }
 0x12d   :  { %v612_v31 = vadd.f32 %v429_v25, %v243_v28 }
 0x12f   :  { %v447_v32 = vpop.eup %446  ;;  %v238_v33 = vpop.f32.mrf.mxu0  ;;  %v392_v34 = vmul.f32 -1.442695, %v612_v31 }
 0x130   :  { %v260_v35 = vadd.f32 1.0, %v447_v32  ;;  %v615_v36 = vadd.f32 %v429_v25, %v238_v33 }
 0x131   :  { %450 = vpow2.f32 %v392_v34 }
 0x132   :  { %v449_v37 = vpop.eup %448  ;;  %452 = vrcp.f32 %v260_v35  ;;  %v390_v39 = vmul.f32 -1.442695, %v615_v36  ;;  %v301_v52 = vand.u32 2147483647, %v260_v35  ;;  %v303_v56 = vand.u32 2147483648, %v260_v35 }
 0x133   :  { %v258_v38 = vadd.f32 1.0, %v449_v37  ;;  %vm297_vm1 = vweird.f32 %v260_v35 }
 0x134   :  { %vm622_vm3 = vcmp.eq.f32.partialorder %v301_v52, 8.507059e+37  ;;  %v304_v2 = vor.u32 1.1754944e-38, %v303_v56 }
 0x135   :  { %454 = vrcp.f32 %v258_v38  ;;  %vm267_vm6 = vweird.f32 %v258_v38  ;;  %v273_v4 = vand.u32 2147483648, %v258_v38  ;;  %v271_v6 = vand.u32 2147483647, %v258_v38 }
 0x136   :  { %456 = vpow2.f32 %v390_v39 }
 0x137   :  { %v451_v40 = vpop.eup %450  ;;  %v274_v19 = vor.u32 1.1754944e-38, %v273_v4  ;;  %vm272_vm12 = vcmp.eq.f32.partialorder %v271_v6, 8.507059e+37 }
 0x138   :  { %v453_v41 = vpop.eup %452  ;;  %v261_v42 = vadd.f32 1.0, %v451_v40 }
 0x139   :  { %v293_v43 = vmul.f32 %v453_v41, %v260_v35  ;;  %vm298_vm0 = vweird.f32 %v453_v41 }
 0x13a   :  { %458 = vrcp.f32 %v261_v42  ;;  %vm618_vm2 = vmor %vm297_vm1, %vm298_vm0  ;;  %v318_v60 = vand.u32 2147483648, %v261_v42  ;;  %v316_v0 = vand.u32 2147483647, %v261_v42  ;;  %vm312_vm7 = vweird.f32 %v261_v42 }
 0x13b   :  { %v455_v44 = vpop.eup %454  ;;  %v294_v45 = vsub.f32 1.0, %v293_v43 }
 0x13c   :  { %v457_v46 = vpop.eup %456  ;;  %v263_v47 = vmul.f32 %v455_v44, %v258_v38  ;;  %vm268_vm5 = vweird.f32 %v455_v44  ;;  %v319_v9 = vor.u32 1.1754944e-38, %v318_v60  ;;  %vm317_vm10 = vcmp.eq.f32.partialorder %v316_v0, 8.507059e+37 }
 0x13d   :  { %v295_v48 = vmul.f32 %v453_v41, %v294_v45  ;;  %v259_v49 = vadd.f32 1.0, %v457_v46  ;;  %vm630_vm9 = vmor %vm267_vm6, %vm268_vm5 }
 0x13e   :  { %v264_v50 = vsub.f32 1.0, %v263_v47 }
 0x13f   :  { %460 = vrcp.f32 %v259_v49  ;;  %v296_v53 = vadd.f32 %v453_v41, %v295_v48  ;;  %v286_v11 = vand.u32 2147483647, %v259_v49  ;;  %v288_v12 = vand.u32 2147483648, %v259_v49 }
 0x140   :  { %v459_v51 = vpop.eup %458  ;;  %v265_v55 = vmul.f32 %v455_v44, %v264_v50  ;;  %vm282_vm13 = vweird.f32 %v259_v49 }
 0x141   :  { %v308_v54 = vmul.f32 %v459_v51, %v261_v42  ;;  %v300_v62 = vsel %vm618_vm2, %v453_v41, %v296_v53  ;;  %vm313_vm4 = vweird.f32 %v459_v51  ;;  %v289_v24 = vor.u32 1.1754944e-38, %v288_v12 }
 0x142   :  { %v266_v1 = vadd.f32 %v455_v44, %v265_v55  ;;  %v305_v7 = vsel %vm622_vm3, %v304_v2, %v300_v62  ;;  %vm314_vm8 = vmor %vm312_vm7, %vm313_vm4  ;;  %vm287_vm15 = vcmp.eq.f32.partialorder %v286_v11, 8.507059e+37 }
 0x143   :  { %v309_v57 = vsub.f32 1.0, %v308_v54  ;;  %v324_v20 = vmul.f32 %v305_v7, %v606_v29 }
 0x144   :  { %v270_v14 = vsel %vm630_vm9, %v455_v44, %v266_v1 }
 0x145   :  { %v461_v61 = vpop.eup %460  ;;  %v310_v63 = vmul.f32 %v459_v51, %v309_v57  ;;  %v275_v23 = vsel %vm272_vm12, %v274_v19, %v270_v14 }
 0x146   :  { %v278_v3 = vmul.f32 %v461_v61, %v259_v49  ;;  %vm283_vm11 = vweird.f32 %v461_v61  ;;  %v322_v29 = vmul.f32 %v275_v23, %v609_v30 }
 0x147   :  { %v311_v5 = vadd.f32 %v459_v51, %v310_v63  ;;  %vm284_vm14 = vmor %vm282_vm13, %vm283_vm11 }
 0x148   :  { %v279_v8 = vsub.f32 1.0, %v278_v3 }
 0x149   :  { %v315_v13 = vsel %vm314_vm8, %v459_v51, %v311_v5 }
 0x14a   :  { %v280_v15 = vmul.f32 %v461_v61, %v279_v8  ;;  %v320_v16 = vsel %vm317_vm10, %v319_v9, %v315_v13 }
 0x14b   :  { %v325_v21 = vmul.f32 %v320_v16, %v612_v31 }
 0x14c   :  { %v281_v22 = vadd.f32 %v461_v61, %v280_v15 }
 0x14d   :  { %v409_v25 = vpack.c.bf16 %v325_v21, %v324_v20 }
 0x14e   :  { %v285_v26 = vsel %vm284_vm14, %v461_v61, %v281_v22 }
 0x14f   :  { %v290_v17 = vsel %vm287_vm15, %v289_v24, %v285_v26  ;;  %411 = vst [vmem:[#allocation5 + $0x8] sm:$0xff] %v409_v25  }
 0x150   :  { %v323_v27 = vmul.f32 %v290_v17, %v615_v36 }
 0x152   :  { %v404_v18 = vpack.c.bf16 %v323_v27, %v322_v29 }
 0x154   :  { %405 = vst [vmem:[#allocation5] sm:$0xff] %v404_v18  }
 0x155   :  { %346 = dma.vmem_to_hbm [thread:$0]  %s339_s10, 256, %s341_s13, [#allocation4], %s515_s23, %s515_s23, %s516_s24  }
 0x156   :  { %512 = dma.done.wait [#allocation4], 256  }
 0x157   :  { %513 = vsyncadd [#allocation4], 4294967040 }
 0x158   :  { %351 = vsyncpa [#allocation3], 1 }
 0x159   :  { %352 = vsyncpa [#allocation4], 1 }

</bundles_post_ra>
